<compile_context>
chip_gen: v7x
topology: tpu7x:2x2x1
jax: 0.10.0
libtpu: 0.0.40
codegen_flags: <defaults>
</compile_context>

<pallas_src>
import functools
import math

import jax
import jax.numpy as jnp
from jax.experimental import pallas as pl
from jax.experimental.pallas import tpu as pltpu

BN_EPS = 1e-5


# ---------------------------------------------------------------------------
# Tiling helpers
# ---------------------------------------------------------------------------
def _choose_tile_m(m):
    """Largest tile that divides m exactly; prefer >=2 grid steps (v7x has 2 TCs)."""
    for t in (512, 256, 128, 64, 32, 16, 8):
        if m % t == 0 and m // t >= 2:
            return t
    for t in (1024, 512, 256, 128, 64, 32, 16, 8):
        if m % t == 0:
            return t
    return 0


def _choose_tile_hw(hw):
    """Spatial tile for the 3-D (batch, HW, C) kernels; full extent when small."""
    if hw <= 1024:
        return hw
    for t in (1024, 512, 256, 128, 64, 32, 16, 8):
        if hw % t == 0:
            return t
    return hw


# ---------------------------------------------------------------------------
# Pallas kernels
# ---------------------------------------------------------------------------
def _mm_shift_act_kernel(x_ref, w_ref, shift_ref, o_ref, *, activation):
    """(TILE_M, K) @ (K, N) with BN scale pre-folded into bf16 weights; + shift; act."""
    x = x_ref[...].astype(jnp.bfloat16)
    y = jnp.dot(x, w_ref[...], preferred_element_type=jnp.float32)
    y = y + shift_ref[...]
    if activation == "relu":
        y = jnp.maximum(y, 0.0)
    o_ref[...] = y.astype(o_ref.dtype)


def matmul_shift_act(x, w_bf16, shift, activation="none"):
    """x: (M, K) f32, w_bf16: (K, N) bf16 (BN scale folded), shift: (N,) f32."""
    m_orig, k = x.shape
    n = w_bf16.shape[1]
    tile = _choose_tile_m(m_orig)
    m = m_orig
    if tile == 0:
        # TODO(synk): masked remainder tiles would avoid this pad/slice copy; never hit
        # for the spatial sizes used by this module.
        tile = min(128, pl.cdiv(m_orig, 8) * 8)
        m = pl.cdiv(m_orig, tile) * tile
        x = jnp.pad(x, ((0, m - m_orig), (0, 0)))

    shift2 = shift.reshape(1, n).astype(jnp.float32)
    cost = pl.CostEstimate(
        flops=2 * m * k * n,
        transcendentals=0,
        bytes_accessed=(m * k + m * n + n) * 4 + k * n * 2,
    )
    out = pl.pallas_call(
        functools.partial(_mm_shift_act_kernel, activation=activation),
        out_shape=jax.ShapeDtypeStruct((m, n), jnp.float32),
        grid=(m // tile,),
        in_specs=[
            pl.BlockSpec((tile, k), lambda i: (i, 0)),
            pl.BlockSpec((k, n), lambda i: (0, 0)),
            pl.BlockSpec((1, n), lambda i: (0, 0)),
        ],
        out_specs=pl.BlockSpec((tile, n), lambda i: (i, 0)),
        compiler_params=pltpu.CompilerParams(dimension_semantics=("parallel",)),
        cost_estimate=cost,
    )(x, w_bf16, shift2)
    return out[:m_orig] if m != m_orig else out


def _se_head_kernel(y_ref, w1_ref, b1_ref, w2_ref, b2_ref, gate_ref):
    """Fused SE head for one batch sample: avgpool -> fc1 -> ReLU -> fc2 -> sigmoid."""
    pooled = jnp.mean(y_ref[0], axis=0, keepdims=True)                    # (1, C)
    s1 = jnp.dot(pooled, w1_ref[...], preferred_element_type=jnp.float32) + b1_ref[...]
    s1 = jnp.maximum(s1, 0.0)
    g = jnp.dot(s1, w2_ref[...], preferred_element_type=jnp.float32) + b2_ref[...]
    gate_ref[0] = jax.nn.sigmoid(g)


def se_head(y, w1, b1, w2, b2):
    """y: (N, HW, C) f32 -> gate: (N, 1, C) f32, one fused kernel, grid over batch."""
    nb, hw, c = y.shape
    w_se = w1.shape[1]
    return pl.pallas_call(
        _se_head_kernel,
        out_shape=jax.ShapeDtypeStruct((nb, 1, c), jnp.float32),
        grid=(nb,),
        in_specs=[
            pl.BlockSpec((1, hw, c), lambda b: (b, 0, 0)),
            pl.BlockSpec((c, w_se), lambda b: (0, 0)),
            pl.BlockSpec((1, w_se), lambda b: (0, 0)),
            pl.BlockSpec((w_se, c), lambda b: (0, 0)),
            pl.BlockSpec((1, c), lambda b: (0, 0)),
        ],
        out_specs=pl.BlockSpec((1, 1, c), lambda b: (b, 0, 0)),
        compiler_params=pltpu.CompilerParams(dimension_semantics=("parallel",)),
    )(y, w1, b1, w2, b2)


def _tail_kernel(y_ref, gate_ref, w_ref, shift_ref, id_ref, o_ref):
    """Fused block tail: (y * gate) @ Wc + shift + identity, then ReLU."""
    ys = y_ref[0] * gate_ref[0]                                           # (T, Cb)
    z = jnp.dot(ys.astype(jnp.bfloat16), w_ref[...],
                preferred_element_type=jnp.float32)
    z = z + shift_ref[...] + id_ref[0]
    o_ref[0] = jnp.maximum(z, 0.0)


def block_tail(y, gate, w_c_bf16, shift_c, x_id):
    """y: (N, HW, Cb), gate: (N, 1, Cb), x_id: (N, HW, Cout) -> (N, HW, Cout)."""
    nb, hw, cb = y.shape
    cout = w_c_bf16.shape[1]
    t = _choose_tile_hw(hw)
    shift2 = shift_c.reshape(1, cout).astype(jnp.float32)
    cost = pl.CostEstimate(
        flops=2 * nb * hw * cb * cout,
        transcendentals=0,
        bytes_accessed=(nb * hw * (cb + 2 * cout) + nb * cb + cout) * 4 + cb * cout * 2,
    )
    return pl.pallas_call(
        _tail_kernel,
        out_shape=jax.ShapeDtypeStruct((nb, hw, cout), jnp.float32),
        grid=(nb, hw // t),
        in_specs=[
            pl.BlockSpec((1, t, cb), lambda b, i: (b, i, 0)),
            pl.BlockSpec((1, 1, cb), lambda b, i: (b, 0, 0)),
            pl.BlockSpec((cb, cout), lambda b, i: (0, 0)),
            pl.BlockSpec((1, cout), lambda b, i: (0, 0)),
            pl.BlockSpec((1, t, cout), lambda b, i: (b, i, 0)),
        ],
        out_specs=pl.BlockSpec((1, t, cout), lambda b, i: (b, i, 0)),
        compiler_params=pltpu.CompilerParams(
            dimension_semantics=("parallel", "parallel")),
        cost_estimate=cost,
    )(y, gate, w_c_bf16, shift2, x_id)


# ---------------------------------------------------------------------------
# Layout plumbing (XLA): im2col for the 3x3 conv
# ---------------------------------------------------------------------------
def _im2col_3x3(x, stride):
    """x: (N, H, W, C) NHWC, pad=1. Returns ((N*Ho*Wo, 9*C), Ho, Wo)."""
    # TODO(synk): the strided 3x3 window extraction stays in XLA; a fully in-kernel tap
    # accumulation needs element-offset BlockSpecs / manual DMA of overlapping windows.
    n, h, w, c = x.shape
    xp = jnp.pad(x, ((0, 0), (1, 1), (1, 1), (0, 0)))
    ho = (h + 2 - 3) // stride + 1
    wo = (w + 2 - 3) // stride + 1
    taps = []
    for dy in range(3):
        for dx in range(3):
            taps.append(xp[:, dy:dy + (ho - 1) * stride + 1:stride,
                           dx:dx + (wo - 1) * stride + 1:stride, :])
    pm = jnp.concatenate(taps, axis=-1)                     # (N, Ho, Wo, 9*C)
    return pm.reshape(n * ho * wo, 9 * c), ho, wo


# ---------------------------------------------------------------------------
# Parameter preparation: fold BN, build block-diagonal grouped-conv matrix, cast bf16
# ---------------------------------------------------------------------------
def bn_fold(bn):
    scale = bn["gamma"] / jnp.sqrt(bn["var"] + BN_EPS)
    shift = bn["beta"] - bn["mean"] * scale
    return scale, shift


def prepare_block(p):
    """Convert torch-style block params into kernel-ready (BN-folded, bf16) params."""
    q = dict(stride=p["stride"], proj=p["proj"], se=p["se"])

    # conv_a (1x1): (Cin, w_b), BN scale folded, bf16.
    sa, ba = bn_fold(p["a_bn"])
    wa = jnp.transpose(p["a_w"][:, :, 0, 0], (1, 0)) * sa[None, :]
    q["a_w"], q["a_shift"] = wa.astype(jnp.bfloat16), ba

    # conv_b (3x3, grouped): block-diagonal dense matrix (9*w_b, w_b), bf16.
    sb, bb = bn_fold(p["b_bn"])
    cb = p["a_w"].shape[0]                     # conv_b in-channels == w_b
    cout_b = p["b_w"].shape[0]
    groups = p["groups"]
    cg, cog = cb // groups, cout_b // groups
    w_full = jnp.zeros((3, 3, cb, cout_b), jnp.float32)
    for g in range(groups):
        wg = jnp.transpose(p["b_w"][g * cog:(g + 1) * cog], (2, 3, 1, 0))  # (3,3,cg,cog)
        w_full = w_full.at[:, :, g * cg:(g + 1) * cg, g * cog:(g + 1) * cog].set(wg)
    wb = (w_full * sb[None, None, None, :]).reshape(9 * cb, cout_b)
    q["b_w"], q["b_shift"] = wb.astype(jnp.bfloat16), bb

    # conv_c (1x1)
    sc, bc = bn_fold(p["c_bn"])
    wc = jnp.transpose(p["c_w"][:, :, 0, 0], (1, 0)) * sc[None, :]
    q["c_w"], q["c_shift"] = wc.astype(jnp.bfloat16), bc

    if p["proj"]:
        sp, bp = bn_fold(p["proj_bn"])
        wp = jnp.transpose(p["proj_w"][:, :, 0, 0], (1, 0)) * sp[None, :]
        q["proj_w"], q["proj_shift"] = wp.astype(jnp.bfloat16), bp

    if p["se"]:
        q["se_w1"] = jnp.transpose(p["se_fc1_w"][:, :, 0, 0], (1, 0))   # (w_b, w_se)
        q["se_b1"] = p["se_fc1_b"].reshape(1, -1)
        q["se_w2"] = jnp.transpose(p["se_fc2_w"][:, :, 0, 0], (1, 0))   # (w_se, w_b)
        q["se_b2"] = p["se_fc2_b"].reshape(1, -1)
    return q


# ---------------------------------------------------------------------------
# Forward pass
# ---------------------------------------------------------------------------
def block_forward(x, q):
    """ResBottleneckBlock forward. x: (N, H, W, w_in) NHWC f32."""
    n, h, w, cin = x.shape
    stride = q["stride"]
    w_b = q["a_w"].shape[1]
    w_out = q["c_w"].shape[1]

    # conv_a: 1x1 + BN + ReLU (one fused matmul kernel)
    y = matmul_shift_act(x.reshape(n * h * w, cin), q["a_w"], q["a_shift"], "relu")
    y = y.reshape(n, h, w, w_b)

    # conv_b: grouped 3x3 + BN + ReLU as ONE lane-dense matmul (block-diag weights)
    pm, ho, wo = _im2col_3x3(y, stride)
    yb = matmul_shift_act(pm, q["b_w"], q["b_shift"], "relu")
    yb = yb.reshape(n, ho * wo, w_b)

    # SE gate (fused avgpool + fc1 + ReLU + fc2 + sigmoid)
    if q["se"]:
        gate = se_head(yb, q["se_w1"], q["se_b1"], q["se_w2"], q["se_b2"])
    else:
        gate = jnp.ones((n, 1, w_b), jnp.float32)

    # identity / projection path
    if q["proj"]:
        xs = x[:, ::stride, ::stride, :]
        x_id = matmul_shift_act(xs.reshape(n * ho * wo, cin),
                                q["proj_w"], q["proj_shift"], "none")
        x_id = x_id.reshape(n, ho * wo, w_out)
    else:
        x_id = x.reshape(n, ho * wo, w_out)

    # fused tail: SE scale + conv_c + BN shift + residual add + ReLU
    out = block_tail(yb, gate, q["c_w"], q["c_shift"], x_id)
    return out.reshape(n, ho, wo, w_out)


def stage_forward(x, stage_params):
    """AnyStage.forward: chain the d blocks."""
    for q in stage_params:
        x = block_forward(x, q)
    return x


# ---------------------------------------------------------------------------
# Deterministic synthetic parameters (PyTorch parameter shapes)
# ---------------------------------------------------------------------------
def init_bn(key, c):
    k1, k2, k3, k4 = jax.random.split(key, 4)
    return dict(
        gamma=jax.random.uniform(k1, (c,), jnp.float32, 0.8, 1.2),
        beta=jax.random.normal(k2, (c,), jnp.float32) * 0.1,
        mean=jax.random.normal(k3, (c,), jnp.float32) * 0.1,
        var=jax.random.uniform(k4, (c,), jnp.float32, 0.8, 1.2),
    )


def init_conv(key, cout, cin, kh, kw):
    fan = cin * kh * kw
    return jax.random.normal(key, (cout, cin, kh, kw), jnp.float32) / math.sqrt(fan)


def init_block(key, w_in, w_out, stride, bm, gw, se_r):
    w_b = int(round(w_out * bm))
    groups = w_b // gw
    w_se = int(round(w_in * se_r)) if se_r else 0
    ks = jax.random.split(key, 12)
    p = dict(stride=stride, groups=groups, se=bool(se_r),
             proj=(w_in != w_out) or (stride != 1))
    p["a_w"] = init_conv(ks[0], w_b, w_in, 1, 1)
    p["a_bn"] = init_bn(ks[1], w_b)
    p["b_w"] = init_conv(ks[2], w_b, w_b // groups, 3, 3)
    p["b_bn"] = init_bn(ks[3], w_b)
    p["c_w"] = init_conv(ks[4], w_out, w_b, 1, 1)
    p["c_bn"] = init_bn(ks[5], w_out)
    if p["proj"]:
        p["proj_w"] = init_conv(ks[6], w_out, w_in, 1, 1)
        p["proj_bn"] = init_bn(ks[7], w_out)
    if se_r:
        p["se_fc1_w"] = init_conv(ks[8], w_se, w_b, 1, 1)
        p["se_fc1_b"] = jax.random.normal(ks[9], (w_se,), jnp.float32) * 0.1
        p["se_fc2_w"] = init_conv(ks[10], w_b, w_se, 1, 1)
        p["se_fc2_b"] = jax.random.normal(ks[11], (w_b,), jnp.float32) * 0.1
    return p


def init_stage(key, w_in, w_out, stride, d, bm, gw, se_r):
    keys = jax.random.split(key, d)
    blocks = []
    for i in range(d):
        b_stride = stride if i == 0 else 1
        b_w_in = w_in if i == 0 else w_out
        blocks.append(init_block(keys[i], b_w_in, w_out, b_stride, bm, gw, se_r))
    return blocks


# ---------------------------------------------------------------------------
# References (correctness check). bf16=True mirrors the kernel's MXU precision
# (BN scale folded into weights before the bf16 cast, f32 accumulation).
# ---------------------------------------------------------------------------
def _ref_conv(x, w_hwio, stride, groups=1, padding=0, bf16=False):
    if bf16:
        x = x.astype(jnp.bfloat16)
        w_hwio = w_hwio.astype(jnp.bfloat16)
    return jax.lax.conv_general_dilated(
        x, w_hwio, (stride, stride), [(padding, padding), (padding, padding)],
        dimension_numbers=("NHWC", "HWIO", "NHWC"),
        feature_group_count=groups, preferred_element_type=jnp.float32)


def _ref_conv_bn(x, w_torch, bn, stride, groups=1, padding=0, bf16=False):
    w = jnp.transpose(w_torch, (2, 3, 1, 0))  # HWIO
    if bf16:
        scale, shift = bn_fold(bn)
        return _ref_conv(x, w * scale[None, None, None, :], stride, groups,
                         padding, bf16=True) + shift
    y = _ref_conv(x, w, stride, groups, padding, bf16=False)
    return (y - bn["mean"]) / jnp.sqrt(bn["var"] + BN_EPS) * bn["gamma"] + bn["beta"]


def _ref_block(x, p, bf16):
    x_id = x
    if p["proj"]:
        x_id = _ref_conv_bn(x, p["proj_w"], p["proj_bn"], p["stride"], bf16=bf16)
    y = jax.nn.relu(_ref_conv_bn(x, p["a_w"], p["a_bn"], 1, bf16=bf16))
    y = jax.nn.relu(_ref_conv_bn(y, p["b_w"], p["b_bn"], p["stride"],
                                 groups=p["groups"], padding=1, bf16=bf16))
    if p["se"]:
        pooled = jnp.mean(y, axis=(1, 2))
        s1 = jax.nn.relu(pooled @ jnp.transpose(p["se_fc1_w"][:, :, 0, 0])
                         + p["se_fc1_b"])
        gate = jax.nn.sigmoid(s1 @ jnp.transpose(p["se_fc2_w"][:, :, 0, 0])
                              + p["se_fc2_b"])
        y = y * gate[:, None, None, :]
    y = _ref_conv_bn(y, p["c_w"], p["c_bn"], 1, bf16=bf16)
    return jax.nn.relu(x_id + y)


def stage_ref(x, raw_params, bf16=False):
    for p in raw_params:
        x = _ref_block(x, p, bf16)
    return x


# ---------------------------------------------------------------------------
if __name__ == "__main__":
    # AnyStage(w_in=8, w_out=16, stride=2, d=2, ResBottleneckBlock, bm=1.0, gw=8, se_r=0.25)
    W_IN, W_OUT, STRIDE, D, BM, GW, SE_R = 8, 16, 2, 2, 1.0, 8, 0.25
    key = jax.random.PRNGKey(0)
    kx, kp = jax.random.split(key)

    x_nchw = jax.random.normal(kx, (2, W_IN, 16, 16), jnp.float32)  # PyTorch NCHW
    raw_params = init_stage(kp, W_IN, W_OUT, STRIDE, D, BM, GW, SE_R)
    stage_params = [prepare_block(p) for p in raw_params]           # BN fold + bf16

    x_nhwc = jnp.transpose(x_nchw, (0, 2, 3, 1))                    # NCHW -> NHWC
    out_nhwc = stage_forward(x_nhwc, stage_params)
    out_nhwc = jax.block_until_ready(out_nhwc)
    out_nchw = jnp.transpose(out_nhwc, (0, 3, 1, 2))
    assert out_nchw.shape == (2, W_OUT, 8, 8), out_nchw.shape

    # Tight check vs a reference that matches the kernel's bf16-MXU / f32-accum precision.
    ref_b = stage_ref(x_nhwc, raw_params, bf16=True)
    err_b = float(jnp.max(jnp.abs(out_nhwc - ref_b)))
    assert err_b < 2e-3, f"mismatch vs bf16-matched reference: {err_b}"

    # Sanity check vs the exact f32 PyTorch-semantics reference (bf16 rounding tolerance).
    ref_f = stage_ref(x_nhwc, raw_params, bf16=False)
    err_f = float(jnp.max(jnp.abs(out_nhwc - ref_f)))
    assert err_f < 1e-1, f"mismatch vs f32 reference: {err_f}"

    print("KERNEL_OK")
</pallas_src>

<mosaic_0001>
module attributes {stable_mosaic.version = 11 : i64} {
  func.func @_mm_shift_act_kernel(%arg0: i32, %arg1: memref<256x8xf32, #tpu.memory_space<vmem>>, %arg2: memref<8x16xbf16, #tpu.memory_space<vmem>>, %arg3: memref<1x16xf32, #tpu.memory_space<vmem>>, %arg4: memref<256x16xf32, #tpu.memory_space<vmem>>) attributes {dimension_semantics = [#tpu.dimension_semantics<parallel>], iteration_bounds = array<i64: 2>, scalar_prefetch = 0 : i64, scratch_operands = 0 : i64, tpu.core_type = #tpu.core_type<tc>, window_params = [{transform_indices = @transform_0, window_bounds = array<i64: 256, 8>}, {pipeline_mode = #tpu.pipeline_mode<synchronous>, transform_indices = @transform_1, window_bounds = array<i64: 8, 16>}, {pipeline_mode = #tpu.pipeline_mode<synchronous>, transform_indices = @transform_2, window_bounds = array<i64: 1, 16>}, {transform_indices = @transform_3, window_bounds = array<i64: 256, 16>}]} {
    %c0 = arith.constant 0 : index
    %c0_0 = arith.constant 0 : index
    %0 = vector.load %arg1[%c0, %c0_0] : memref<256x8xf32, #tpu.memory_space<vmem>>, vector<256x8xf32>
    %1 = arith.truncf %0 : vector<256x8xf32> to vector<256x8xbf16>
    %c0_1 = arith.constant 0 : index
    %c0_2 = arith.constant 0 : index
    %2 = vector.load %arg2[%c0_1, %c0_2] : memref<8x16xbf16, #tpu.memory_space<vmem>>, vector<8x16xbf16>
    %cst = arith.constant dense<0.000000e+00> : vector<256x16xf32>
    %3 = tpu.matmul %1, %2, %cst {dimension_numbers = #tpu.dot_dimension_numbers<[1], [0], [0], [1], [0, 0, 1, 1], [], []>} : vector<256x8xbf16>, vector<8x16xbf16>, vector<256x16xf32> -> vector<256x16xf32>
    %c0_3 = arith.constant 0 : index
    %c0_4 = arith.constant 0 : index
    %4 = vector.load %arg3[%c0_3, %c0_4] : memref<1x16xf32, #tpu.memory_space<vmem>>, vector<1x16xf32>
    %5 = vector.broadcast %4 : vector<1x16xf32> to vector<256x16xf32>
    %6 = arith.addf %3, %5 : vector<256x16xf32>
    %cst_5 = arith.constant 0.000000e+00 : f32
    %7 = vector.broadcast %cst_5 : f32 to vector<256x16xf32>
    %8 = arith.maximumf %6, %7 : vector<256x16xf32>
    %c0_6 = arith.constant 0 : index
    %c0_7 = arith.constant 0 : index
    %9 = vector.load %arg4[%c0_6, %c0_7] : memref<256x16xf32, #tpu.memory_space<vmem>>, vector<256x16xf32>
    tpu.vector_store %arg4[%c0_6, %c0_7], %8 {strides = array<i32>} : memref<256x16xf32, #tpu.memory_space<vmem>>, vector<256x16xf32>,
    return
  }
  func.func @transform_0(%arg0: i32) -> (i32, i32) {
    %c0_i32 = arith.constant 0 : i32
    %c0_i32_0 = arith.constant 0 : i32
    return %arg0, %c0_i32 : i32, i32
  }
  func.func @transform_1(%arg0: i32) -> (i32, i32) {
    %c0_i32 = arith.constant 0 : i32
    %c0_i32_0 = arith.constant 0 : i32
    %c0_i32_1 = arith.constant 0 : i32
    return %c0_i32, %c0_i32_0 : i32, i32
  }
  func.func @transform_2(%arg0: i32) -> (i32, i32) {
    %c0_i32 = arith.constant 0 : i32
    %c0_i32_0 = arith.constant 0 : i32
    %c0_i32_1 = arith.constant 0 : i32
    return %c0_i32, %c0_i32_0 : i32, i32
  }
  func.func @transform_3(%arg0: i32) -> (i32, i32) {
    %c0_i32 = arith.constant 0 : i32
    %c0_i32_0 = arith.constant 0 : i32
    return %arg0, %c0_i32 : i32, i32
  }
}

</mosaic_0001>

<bundles_post_ra>
// kernel: tpu_custom_call.1
= control target key start
LH: loop header
LB: loop body
LE: loop exit
PB: predicated region body
PF: predicated region fallthrough
CT: control target
= control target key end

     0   :  { %s685_s12 = smov 0   ;;  %s865_s0 = inlined_call_operand.vmem [shape: f32[512,8], index: 0, kind: input, shape index: {}]   ;;  %s866_s1 = inlined_call_operand.vmem [shape: bf16[8,16], index: 1, kind: input, shape index: {}]   ;;  %s867_s2 = inlined_call_operand.vmem [shape: f32[1,16], index: 2, kind: input, shape index: {}]   ;;  %s868_s3 = inlined_call_operand.vmem [shape: f32[512,16], index: 3, kind: output, shape index: {}]  }
   0x1 LB: > { %s566_s13 = sadd.s32 4294967295, %s663_s12   ;;  %p570_p0 = scmp.ge.s32.totalorder %s663_s12, 1  ;;  %s663_s12 = sphi %s685_s12, %s13_s12  }
   0x2   : > { %p138_p1 = scmp.lt.s32.totalorder %s663_s12, 3 }
   0x4   : > { %p139_p2 = pnand %p570_p0, %p138_p1 }
   0x5   : > { %v223_v0 = vld [vmem:[%s866_s1] sm:$0xf] (!%p139_p2)  ;;  %vm280_vm0 = vcmask (!%p139_p2), 1043456   ;;  %s571_s16 = sshll.u32 (!%p139_p2), %s566_s13, 5  ;;  %vm231_vm1 = vcmask (!%p139_p2), 64512   ;;  %vm477_vm2 = vcmask (!%p139_p2), 130048  }
   0x6   : > { %142 = sbr.rel (%p139_p2) target bundleno = 265 (0x109), region = 32  ;;  %647 = vmatprep.subr.msk.bf16.mxu0 (!%p139_p2), %vm280_vm0, %v223_v0  ;;  %648 = vmatprep.subr.msk.bf16.mxu1 (!%p139_p2), %vm280_vm0, %v223_v0  ;;  %v282_v1 = vsel (!%p139_p2), %vm280_vm0, %v223_v0, 0  ;;  %p163_p3 = scmp.lt.s32.totalorder (!%p139_p2), %s571_s16, 63  ;;  %v757_v50 = vld [vmem:[%s867_s2] ss:$0 sm:$0xff] (!%p139_p2) }
   0x7   : > { %612 = vmatpush3.bf16.msra.mxu0 (!%p139_p2), %v282_v1  ;;  %646 = vmatpush3.bf16.msra.mxu1 (!%p139_p2), %v282_v1 }
   0xd   : > { %s870_s16 = smov (!%p163_p3, %s571_s16), 63 }
   0xe   : > { %s572_s17 = sshll.u32 %s870_s16, 3 }
   0xf   : > { %s704_s20 = scalar_lea.vmem %s865_s0, %s572_s17  ;;  %s765_s25 = scalar_lea.vmem %s868_s3, %s572_s17 }
  0x10   : > { %v175_v2 = vld [vmem:[%s704_s20] sm:$0xff]  ;;  %v176_v3 = vld [vmem:[%s704_s20 + $0x8] sm:$0xff]  ;;  %v177_v7 = vld [vmem:[%s704_s20 + $0x10] sm:$0xff] }
  0x11   : > { %v191_v4 = vld [vmem:[%s704_s20 + $0x80] sm:$0xff]  ;;  %v207_v5 = vpack.c.bf16 %v176_v3, %v175_v2  ;;  %v192_v6 = vld [vmem:[%s704_s20 + $0x88] sm:$0xff]  ;;  %v178_v8 = vld [vmem:[%s704_s20 + $0x18] sm:$0xff] }
  0x12   : > { %v215_v9 = vpack.c.bf16 %v192_v6, %v191_v4  ;;  %v208_v10 = vpack.c.bf16 %v178_v8, %v177_v7  ;;  %v193_v11 = vld [vmem:[%s704_s20 + $0x90] sm:$0xff]  ;;  %v194_v12 = vld [vmem:[%s704_s20 + $0x98] sm:$0xff]  ;;  %v179_v13 = vld [vmem:[%s704_s20 + $0x20] sm:$0xff] }
  0x13   : > { %613 = vmatprep.mubr.msk.bf16.mxu0 %vm231_vm1, %v207_v5  ;;  %v216_v14 = vpack.c.bf16 %v194_v12, %v193_v11  ;;  %v180_v15 = vld [vmem:[%s704_s20 + $0x28] sm:$0xff]  ;;  %v195_v16 = vld [vmem:[%s704_s20 + $0xa0] sm:$0xff]  ;;  %v181_v20 = vld [vmem:[%s704_s20 + $0x30] sm:$0xff] }
  0x14   : > { %v196_v17 = vld [vmem:[%s704_s20 + $0xa8] sm:$0xff]  ;;  %629 = vmatprep.mubr.msk.bf16.mxu1 %vm231_vm1, %v215_v9  ;;  %614 = vmatmul.mubr.msk.bf16.vlgmr.msra.gmra.mrb[0].mxu0 %vm231_vm1, %v208_v10  ;;  %v209_v18 = vpack.c.bf16 %v180_v15, %v179_v13  ;;  %v182_v21 = vld [vmem:[%s704_s20 + $0x38] sm:$0xff]  ;;  %v197_v22 = vld [vmem:[%s704_s20 + $0xb0] sm:$0xff] }
  0x15   : > { %v217_v19 = vpack.c.bf16 %v196_v17, %v195_v16  ;;  %630 = vmatmul.mubr.msk.bf16.vlgmr.msra.gmra.mrb[0].mxu1 %vm231_vm1, %v216_v14  ;;  %v198_v23 = vld [vmem:[%s704_s20 + $0xb8] sm:$0xff]  ;;  %v183_v24 = vld [vmem:[%s704_s20 + $0x40] sm:$0xff]  ;;  %v184_v25 = vld [vmem:[%s704_s20 + $0x48] sm:$0xff]  ;;  %v210_v28 = vpack.c.bf16 %v182_v21, %v181_v20 }
  0x16   : > { %617 = vmatprep.mubr.msk.bf16.mxu0 %vm231_vm1, %v209_v18  ;;  %v199_v26 = vld [vmem:[%s704_s20 + $0xc0] sm:$0xff]  ;;  %v200_v27 = vld [vmem:[%s704_s20 + $0xc8] sm:$0xff]  ;;  %v218_v29 = vpack.c.bf16 %v198_v23, %v197_v22  ;;  %v211_v30 = vpack.c.bf16 %v184_v25, %v183_v24  ;;  %v185_v32 = vld [vmem:[%s704_s20 + $0x50] sm:$0xff] }
  0x17   : > { %633 = vmatprep.mubr.msk.bf16.mxu1 %vm231_vm1, %v217_v19  ;;  %v219_v31 = vpack.c.bf16 %v200_v27, %v199_v26  ;;  %v186_v33 = vld [vmem:[%s704_s20 + $0x58] sm:$0xff]  ;;  %v201_v34 = vld [vmem:[%s704_s20 + $0xd0] sm:$0xff]  ;;  %v187_v36 = vld [vmem:[%s704_s20 + $0x60] sm:$0xff] }
  0x18   : > { %v202_v35 = vld [vmem:[%s704_s20 + $0xd8] sm:$0xff]  ;;  %v188_v37 = vld [vmem:[%s704_s20 + $0x68] sm:$0xff]  ;;  %v203_v38 = vld [vmem:[%s704_s20 + $0xe0] sm:$0xff]  ;;  %v212_v40 = vpack.c.bf16 %v186_v33, %v185_v32 }
  0x19   : > { %v204_v39 = vld [vmem:[%s704_s20 + $0xe8] sm:$0xff]  ;;  %v220_v41 = vpack.c.bf16 %v202_v35, %v201_v34  ;;  %v213_v42 = vpack.c.bf16 %v188_v37, %v187_v36  ;;  %v189_v44 = vld [vmem:[%s704_s20 + $0x70] sm:$0xff]  ;;  %v190_v45 = vld [vmem:[%s704_s20 + $0x78] sm:$0xff] }
  0x1a   : > { %v221_v43 = vpack.c.bf16 %v204_v39, %v203_v38  ;;  %v205_v46 = vld [vmem:[%s704_s20 + $0xf0] sm:$0xff]  ;;  %v206_v47 = vld [vmem:[%s704_s20 + $0xf8] sm:$0xff]  ;;  %v214_v48 = vpack.c.bf16 %v190_v45, %v189_v44 }
  0x1b   : > { %v222_v49 = vpack.c.bf16 %v206_v47, %v205_v46 }
  0x1c   : > { %618 = vmatmul.mubr.msk.bf16.gmra.mrb[4].mxu0 %vm231_vm1, %v210_v28 }
  0x1d   : > { %634 = vmatmul.mubr.msk.bf16.gmra.mrb[4].mxu1 %vm231_vm1, %v218_v29  ;;  %621 = vmatprep.mubr.msk.bf16.mxu0 %vm231_vm1, %v211_v30 }
  0x1e   : > { %637 = vmatprep.mubr.msk.bf16.mxu1 %vm231_vm1, %v219_v31 }
  0x24   : > { %622 = vmatmul.mubr.msk.bf16.gmra.mrb[8].mxu0 %vm231_vm1, %v212_v40 }
  0x25   : > { %638 = vmatmul.mubr.msk.bf16.gmra.mrb[8].mxu1 %vm231_vm1, %v220_v41  ;;  %625 = vmatprep.mubr.msk.bf16.mxu0 %vm231_vm1, %v213_v42 }
  0x26   : > { %641 = vmatprep.mubr.msk.bf16.mxu1 %vm231_vm1, %v221_v43 }
  0x2c   : > { %626 = vmatmul.mubr.msk.bf16.gmra.mrb[12].mxu0 %vm231_vm1, %v214_v48 }
  0x2d   : > { %642 = vmatmul.mubr.msk.bf16.gmra.mrb[12].mxu1 %vm231_vm1, %v222_v49 }
  0xe7   : > { %v615_v51 = vpop.f32.mrb[0].mxu0 }
  0xe8   : > { %v327_v52 = vadd.f32 %v615_v51, %v757_v50  ;;  %v631_v53 = vpop.f32.mrb[0].mxu1  ;;  %v318_v54 = vpop.f32.mrb[1].mxu0 }
  0xe9   : > { %v391_v55 = vadd.f32 %v631_v53, %v757_v50  ;;  %v319_v56 = vadd.f32 %v757_v50, %v318_v54  ;;  %v382_v57 = vpop.f32.mrb[1].mxu1  ;;  %v616_v58 = vpop.f32.mrb[2].mxu0 }
  0xea   : > { %v447_v59 = vmax.f32 %v327_v52, 0.0  ;;  %v383_v60 = vadd.f32 %v757_v50, %v382_v57  ;;  %v330_v61 = vadd.f32 %v616_v58, %v757_v50  ;;  %v632_v62 = vpop.f32.mrb[2].mxu1  ;;  %v321_v63 = vpop.f32.mrb[3].mxu0 }
  0xeb   : > { %v463_v0 = vmax.f32 %v391_v55, 0.0  ;;  %v445_v1 = vmax.f32 %v319_v56, 0.0  ;;  %v394_v2 = vadd.f32 %v632_v62, %v757_v50  ;;  %v322_v3 = vadd.f32 %v757_v50, %v321_v63  ;;  %v385_v4 = vpop.f32.mrb[3].mxu1 }
  0xec   : > { %480 = vst.msk [vmem:[%s765_s25 + $0x10] sm:$0xff] %vm477_vm2, %v447_v59  ;;  %v461_v5 = vmax.f32 %v383_v60, 0.0  ;;  %v448_v6 = vmax.f32 %v330_v61, 0.0  ;;  %v386_v7 = vadd.f32 %v757_v50, %v385_v4 }
  0xed   : > { %496 = vst.msk [vmem:[%s765_s25 + $0x90] sm:$0xff] %vm477_vm2, %v463_v0  ;;  %478 = vst.msk [vmem:[%s765_s25] sm:$0xff] %vm477_vm2, %v445_v1  ;;  %v464_v8 = vmax.f32 %v394_v2, 0.0  ;;  %v446_v9 = vmax.f32 %v322_v3, 0.0 }
  0xee   : > { %494 = vst.msk [vmem:[%s765_s25 + $0x80] sm:$0xff] %vm477_vm2, %v461_v5  ;;  %481 = vst.msk [vmem:[%s765_s25 + $0x18] sm:$0xff] %vm477_vm2, %v448_v6  ;;  %v462_v10 = vmax.f32 %v386_v7, 0.0 }
  0xef   : > { %497 = vst.msk [vmem:[%s765_s25 + $0x98] sm:$0xff] %vm477_vm2, %v464_v8  ;;  %479 = vst.msk [vmem:[%s765_s25 + $0x8] sm:$0xff] %vm477_vm2, %v446_v9  ;;  %v619_v11 = vpop.f32.mrb[4].mxu0 }
  0xf0   : > { %495 = vst.msk [vmem:[%s765_s25 + $0x88] sm:$0xff] %vm477_vm2, %v462_v10  ;;  %v343_v12 = vadd.f32 %v619_v11, %v757_v50  ;;  %v635_v13 = vpop.f32.mrb[4].mxu1  ;;  %v334_v14 = vpop.f32.mrb[5].mxu0 }
  0xf1   : > { %v407_v15 = vadd.f32 %v635_v13, %v757_v50  ;;  %v335_v16 = vadd.f32 %v757_v50, %v334_v14  ;;  %v398_v17 = vpop.f32.mrb[5].mxu1  ;;  %v620_v18 = vpop.f32.mrb[6].mxu0 }
  0xf2   : > { %v451_v19 = vmax.f32 %v343_v12, 0.0  ;;  %v399_v20 = vadd.f32 %v757_v50, %v398_v17  ;;  %v346_v21 = vadd.f32 %v620_v18, %v757_v50  ;;  %v636_v22 = vpop.f32.mrb[6].mxu1  ;;  %v337_v23 = vpop.f32.mrb[7].mxu0 }
  0xf3   : > { %v467_v24 = vmax.f32 %v407_v15, 0.0  ;;  %v449_v25 = vmax.f32 %v335_v16, 0.0  ;;  %v410_v26 = vadd.f32 %v636_v22, %v757_v50  ;;  %v338_v27 = vadd.f32 %v757_v50, %v337_v23  ;;  %v401_v28 = vpop.f32.mrb[7].mxu1 }
  0xf4   : > { %484 = vst.msk [vmem:[%s765_s25 + $0x30] sm:$0xff] %vm477_vm2, %v451_v19  ;;  %v465_v29 = vmax.f32 %v399_v20, 0.0  ;;  %v452_v30 = vmax.f32 %v346_v21, 0.0  ;;  %v402_v31 = vadd.f32 %v757_v50, %v401_v28 }
  0xf5   : > { %500 = vst.msk [vmem:[%s765_s25 + $0xb0] sm:$0xff] %vm477_vm2, %v467_v24  ;;  %482 = vst.msk [vmem:[%s765_s25 + $0x20] sm:$0xff] %vm477_vm2, %v449_v25  ;;  %v468_v32 = vmax.f32 %v410_v26, 0.0  ;;  %v450_v33 = vmax.f32 %v338_v27, 0.0 }
  0xf6   : > { %498 = vst.msk [vmem:[%s765_s25 + $0xa0] sm:$0xff] %vm477_vm2, %v465_v29  ;;  %485 = vst.msk [vmem:[%s765_s25 + $0x38] sm:$0xff] %vm477_vm2, %v452_v30  ;;  %v466_v34 = vmax.f32 %v402_v31, 0.0 }
  0xf7   : > { %501 = vst.msk [vmem:[%s765_s25 + $0xb8] sm:$0xff] %vm477_vm2, %v468_v32  ;;  %483 = vst.msk [vmem:[%s765_s25 + $0x28] sm:$0xff] %vm477_vm2, %v450_v33  ;;  %v623_v35 = vpop.f32.mrb[8].mxu0 }
  0xf8   : > { %499 = vst.msk [vmem:[%s765_s25 + $0xa8] sm:$0xff] %vm477_vm2, %v466_v34  ;;  %v359_v36 = vadd.f32 %v623_v35, %v757_v50  ;;  %v639_v37 = vpop.f32.mrb[8].mxu1  ;;  %v350_v38 = vpop.f32.mrb[9].mxu0 }
  0xf9   : > { %v423_v39 = vadd.f32 %v639_v37, %v757_v50  ;;  %v351_v40 = vadd.f32 %v757_v50, %v350_v38  ;;  %v414_v41 = vpop.f32.mrb[9].mxu1  ;;  %v624_v42 = vpop.f32.mrb[10].mxu0 }
  0xfa   : > { %v455_v43 = vmax.f32 %v359_v36, 0.0  ;;  %v415_v44 = vadd.f32 %v757_v50, %v414_v41  ;;  %v362_v45 = vadd.f32 %v624_v42, %v757_v50  ;;  %v640_v46 = vpop.f32.mrb[10].mxu1  ;;  %v353_v47 = vpop.f32.mrb[11].mxu0 }
  0xfb   : > { %v471_v48 = vmax.f32 %v423_v39, 0.0  ;;  %v453_v49 = vmax.f32 %v351_v40, 0.0  ;;  %v426_v51 = vadd.f32 %v640_v46, %v757_v50  ;;  %v354_v52 = vadd.f32 %v757_v50, %v353_v47  ;;  %v417_v53 = vpop.f32.mrb[11].mxu1 }
  0xfc   : > { %488 = vst.msk [vmem:[%s765_s25 + $0x50] sm:$0xff] %vm477_vm2, %v455_v43  ;;  %v469_v54 = vmax.f32 %v415_v44, 0.0  ;;  %v456_v55 = vmax.f32 %v362_v45, 0.0  ;;  %v418_v56 = vadd.f32 %v757_v50, %v417_v53 }
  0xfd   : > { %504 = vst.msk [vmem:[%s765_s25 + $0xd0] sm:$0xff] %vm477_vm2, %v471_v48  ;;  %486 = vst.msk [vmem:[%s765_s25 + $0x40] sm:$0xff] %vm477_vm2, %v453_v49  ;;  %v472_v57 = vmax.f32 %v426_v51, 0.0  ;;  %v454_v58 = vmax.f32 %v354_v52, 0.0 }
  0xfe   : > { %502 = vst.msk [vmem:[%s765_s25 + $0xc0] sm:$0xff] %vm477_vm2, %v469_v54  ;;  %489 = vst.msk [vmem:[%s765_s25 + $0x58] sm:$0xff] %vm477_vm2, %v456_v55  ;;  %v470_v59 = vmax.f32 %v418_v56, 0.0 }
  0xff   : > { %505 = vst.msk [vmem:[%s765_s25 + $0xd8] sm:$0xff] %vm477_vm2, %v472_v57  ;;  %487 = vst.msk [vmem:[%s765_s25 + $0x48] sm:$0xff] %vm477_vm2, %v454_v58  ;;  %v627_v60 = vpop.f32.mrb[12].mxu0 }
 0x100   : > { %503 = vst.msk [vmem:[%s765_s25 + $0xc8] sm:$0xff] %vm477_vm2, %v470_v59  ;;  %v375_v61 = vadd.f32 %v627_v60, %v757_v50  ;;  %v643_v62 = vpop.f32.mrb[12].mxu1  ;;  %v366_v63 = vpop.f32.mrb[13].mxu0 }
 0x101   : > { %v439_v0 = vadd.f32 %v643_v62, %v757_v50  ;;  %v367_v1 = vadd.f32 %v757_v50, %v366_v63  ;;  %v430_v2 = vpop.f32.mrb[13].mxu1  ;;  %v628_v3 = vpop.f32.mrb[14].mxu0 }
 0x102   : > { %v459_v4 = vmax.f32 %v375_v61, 0.0  ;;  %v431_v5 = vadd.f32 %v757_v50, %v430_v2  ;;  %v378_v6 = vadd.f32 %v628_v3, %v757_v50  ;;  %v644_v7 = vpop.f32.mrb[14].mxu1  ;;  %v369_v8 = vpop.f32.mrb[15].mxu0 }
 0x103   : > { %v475_v9 = vmax.f32 %v439_v0, 0.0  ;;  %v457_v10 = vmax.f32 %v367_v1, 0.0  ;;  %v442_v11 = vadd.f32 %v644_v7, %v757_v50  ;;  %v370_v12 = vadd.f32 %v757_v50, %v369_v8  ;;  %v433_v13 = vpop.f32.mrb[15].mxu1 }
 0x104   : > { %492 = vst.msk [vmem:[%s765_s25 + $0x70] sm:$0xff] %vm477_vm2, %v459_v4  ;;  %v473_v14 = vmax.f32 %v431_v5, 0.0  ;;  %v460_v15 = vmax.f32 %v378_v6, 0.0  ;;  %v434_v16 = vadd.f32 %v757_v50, %v433_v13 }
 0x105   : > { %508 = vst.msk [vmem:[%s765_s25 + $0xf0] sm:$0xff] %vm477_vm2, %v475_v9  ;;  %490 = vst.msk [vmem:[%s765_s25 + $0x60] sm:$0xff] %vm477_vm2, %v457_v10  ;;  %v476_v17 = vmax.f32 %v442_v11, 0.0  ;;  %v458_v18 = vmax.f32 %v370_v12, 0.0 }
 0x106   : > { %506 = vst.msk [vmem:[%s765_s25 + $0xe0] sm:$0xff] %vm477_vm2, %v473_v14  ;;  %493 = vst.msk [vmem:[%s765_s25 + $0x78] sm:$0xff] %vm477_vm2, %v460_v15  ;;  %v474_v19 = vmax.f32 %v434_v16, 0.0 }
 0x107   : > { %509 = vst.msk [vmem:[%s765_s25 + $0xf8] sm:$0xff] %vm477_vm2, %v476_v17  ;;  %491 = vst.msk [vmem:[%s765_s25 + $0x68] sm:$0xff] %vm477_vm2, %v458_v18 }
 0x108   : > { %507 = vst.msk [vmem:[%s765_s25 + $0xe8] sm:$0xff] %vm477_vm2, %v474_v19 }
 0x109 PF: > { %s13_s12 = sadd.s32 1, %s663_s12  }
 0x10a   : > { %p10_p4 = scmp.ge.s32.totalorder %s13_s12, 4  }
 0x10c   :  { %12 = sbr.rel (!%p10_p4) target bundleno = 1 (0x1), region = 62 }

</bundles_post_ra>
